<compile_context>
chip_gen: v6e
topology: v6e:2x2x1
jax: 0.10.0
libtpu: 0.0.40
codegen_flags: <defaults>
</compile_context>

<pallas_src>
import functools

import jax
import jax.numpy as jnp
from jax import lax
from jax.experimental import pallas as pl
from jax.experimental.pallas import tpu as pltpu


def _round_up(x, m):
    return ((x + m - 1) // m) * m


def _pick_tile_m(M, tm_max=512, tm_min=128):
    """Pick a row tile that avoids padding the (M, K) patches array when possible."""
    M8 = _round_up(M, 8)
    if M8 <= tm_max:
        return M8, M8
    for cand in range(tm_max, tm_min - 1, -8):
        if M8 % cand == 0:
            return cand, M8
    return tm_max, _round_up(M8, tm_max)


# ----------------------------------------------------------------------------
# Pallas kernel: K-tiled bf16 matmul with f32 accumulator, fused bias + ReLU
# ----------------------------------------------------------------------------
def _convblock_kernel(p_ref, w_ref, bias_ref, o_ref, acc_ref):
    # p_ref:    (tm, tk)  bf16 im2col patches tile
    # w_ref:    (tk, tn)  bf16 conv weight tile (BN scale pre-folded)
    # bias_ref: (1, tn)   f32 folded BN bias  (beta - mean * scale)
    # o_ref:    (tm, tn)  output tile
    # acc_ref:  (tm, tn)  f32 accumulator scratch (resident across the K axis)
    kk = pl.program_id(2)

    @pl.when(kk == 0)
    def _():
        acc_ref[...] = jnp.zeros_like(acc_ref)

    acc_ref[...] += jnp.dot(p_ref[...], w_ref[...],
                            preferred_element_type=jnp.float32)

    @pl.when(kk == pl.num_programs(2) - 1)
    def _():
        o_ref[...] = jnp.maximum(acc_ref[...] + bias_ref[...], 0.0).astype(o_ref.dtype)


def _fused_matmul_bias_relu(patches_bf16, w2d, bias, *, tm_max=512, tk_max=1024,
                            out_dtype=jnp.float32):
    """patches_bf16: (M, K) bf16, w2d: (K, Cout) f32 (scale folded), bias: (Cout,)."""
    M, K = patches_bf16.shape
    Cout = w2d.shape[1]

    # Row tile: up to tm_max rows; prefer a divisor of M (rounded to 8) so we
    # skip the jnp.pad HBM pass over the patches array.
    # (On v5e a tm_max of 256 is enough to be compute-bound; 512 targets v6e/v7x.)
    tm, M_pad = _pick_tile_m(M, tm_max=tm_max)

    # Lane-dense output: 256-wide tiles match the v6e/v7x 256x256 MXU; fall back
    # to 128 for small channel counts (and the v5e 128-wide MXU path still works).
    Cout_128 = _round_up(Cout, 128)
    tn = 256 if Cout_128 >= 256 else 128
    Cout_pad = _round_up(Cout, tn)

    # K tiling: single step when K is small, otherwise 1024-wide chunks so the
    # VMEM footprint is bounded independent of K.
    if K <= tk_max:
        tk, K_pad = K, K
    else:
        tk = tk_max
        K_pad = _round_up(K, tk)

    if M_pad != M or K_pad != K:
        patches_bf16 = jnp.pad(patches_bf16, ((0, M_pad - M), (0, K_pad - K)))
    if Cout_pad != Cout or K_pad != K:
        w2d = jnp.pad(w2d, ((0, K_pad - K), (0, Cout_pad - Cout)))
    if Cout_pad != Cout:
        bias = jnp.pad(bias, ((0, Cout_pad - Cout),))

    w2d_bf16 = w2d.astype(jnp.bfloat16)           # small; cast is cheap
    bias2 = bias.reshape(1, Cout_pad).astype(jnp.float32)

    grid = (M_pad // tm, Cout_pad // tn, K_pad // tk)

    # VMEM budget: double-buffered tiles (the 2x IS the double-buffering) plus
    # the accumulator, with 25% headroom; capped well below v7x's 64 MiB.
    footprint = (
        2 * tm * tk * 2       # patches tile, bf16, double-buffered
        + 2 * tk * tn * 2     # weight tile, bf16, double-buffered
        + 2 * 1 * tn * 4      # bias tile, f32, double-buffered
        + 2 * tm * tn * 4     # output tile, f32, double-buffered
        + tm * tn * 4         # f32 accumulator scratch
    )
    vmem_limit = int(min(48 * 2**20, max(32 * 2**20, int(footprint * 1.25))))

    cost = pl.CostEstimate(
        flops=2 * M_pad * K_pad * Cout_pad,
        transcendentals=0,
        bytes_accessed=(
            M_pad * K_pad * 2 + K_pad * Cout_pad * 2 + Cout_pad * 4
            + M_pad * Cout_pad * jnp.dtype(out_dtype).itemsize
        ),
    )

    out = pl.pallas_call(
        _convblock_kernel,
        out_shape=jax.ShapeDtypeStruct((M_pad, Cout_pad), out_dtype),
        grid_spec=pltpu.PrefetchScalarGridSpec(
            num_scalar_prefetch=0,
            grid=grid,
            in_specs=[
                pl.BlockSpec((tm, tk), lambda i, j, kk: (i, kk)),
                pl.BlockSpec((tk, tn), lambda i, j, kk: (kk, j)),
                pl.BlockSpec((1, tn), lambda i, j, kk: (0, j)),
            ],
            out_specs=pl.BlockSpec((tm, tn), lambda i, j, kk: (i, j)),
            scratch_shapes=[pltpu.VMEM((tm, tn), jnp.float32)],
        ),
        compiler_params=pltpu.CompilerParams(
            dimension_semantics=("parallel", "parallel", "arbitrary"),
            vmem_limit_bytes=vmem_limit,
        ),
        cost_estimate=cost,
    )(patches_bf16, w2d_bf16, bias2)
    return out[:M, :Cout]


# ----------------------------------------------------------------------------
# ConvBlock wrapper (glue: bf16 NHWC, im2col, weight reshape, BN folding)
# ----------------------------------------------------------------------------
@functools.partial(jax.jit, static_argnames=("stride",))
def conv_block_forward(x_nchw, weight, gamma, beta, running_mean, running_var,
                       *, stride=1, eps=1e-5):
    """ConvBlock forward.

    x_nchw : (N, Cin, H, W)
    weight : (Cout, Cin, k, k)   (PyTorch Conv2d layout, bias=False)
    gamma, beta, running_mean, running_var : (Cout,)
    Returns (N, Cout, Ho, Wo) f32 — same layout/semantics as the PyTorch module.
    """
    N, Cin, H, W = x_nchw.shape
    Cout, Cin_w, k, _ = weight.shape
    assert Cin_w == Cin, "groups=1 path only"  # TODO(synk): depthwise unsupported
    pad = k // 2
    Ho = (H + 2 * pad - k) // stride + 1
    Wo = (W + 2 * pad - k) // stride + 1

    # bf16 NHWC on the hot path: cast before the transpose/slicing so every glue
    # op touching the activation moves half the bytes.
    x = jnp.transpose(x_nchw.astype(jnp.bfloat16), (0, 2, 3, 1))

    if k == 1:
        # Fast path: 1x1 conv needs no im2col / spatial padding at all.
        patches = x[:, ::stride, ::stride, :].reshape(N * Ho * Wo, Cin)
    else:
        # bf16 im2col patch extraction: (N, Ho, Wo, k*k, Cin) -> (M, K).
        # TODO(synk): fuse the k*k tap loop into the kernel (tap grid axis with an
        #             f32 VMEM accumulator and shifted-window input indexing) to
        #             remove this remaining bf16 im2col materialization for k > 1.
        xp = jnp.pad(x, ((0, 0), (pad, pad), (pad, pad), (0, 0)))
        cols = []
        for kh in range(k):
            for kw in range(k):
                cols.append(
                    lax.slice(
                        xp,
                        (0, kh, kw, 0),
                        (N, kh + (Ho - 1) * stride + 1,
                         kw + (Wo - 1) * stride + 1, Cin),
                        (1, stride, stride, 1),
                    )
                )
        patches = jnp.stack(cols, axis=3).reshape(N * Ho * Wo, k * k * Cin)

    # Fold BatchNorm (eval mode) into per-channel scale/bias; fold the scale into
    # the weight so the kernel epilogue is only bias + ReLU.
    scale = gamma / jnp.sqrt(running_var + eps)
    bias = beta - running_mean * scale
    w2d = jnp.transpose(weight.astype(jnp.float32), (2, 3, 1, 0)).reshape(
        k * k * Cin, Cout
    )
    w2d = w2d * scale[None, :]

    out2d = _fused_matmul_bias_relu(patches, w2d, bias)  # (M, Cout) f32

    out = out2d.reshape(N, Ho, Wo, Cout)
    # TODO(synk): when chaining ConvBlocks, emit bf16 NHWC here (out_dtype=bf16,
    #             skip this transpose) to avoid two full-activation HBM copies per
    #             block; f32 NCHW kept for PyTorch output parity.
    return jnp.transpose(out, (0, 3, 1, 2))


# ----------------------------------------------------------------------------
# Pure-JAX reference (for correctness check)
# ----------------------------------------------------------------------------
def conv_block_reference(x_nchw, weight, gamma, beta, running_mean, running_var,
                         *, stride=1, eps=1e-5):
    pad = weight.shape[-1] // 2
    y = lax.conv_general_dilated(
        x_nchw.astype(jnp.float32),
        weight.astype(jnp.float32),
        window_strides=(stride, stride),
        padding=((pad, pad), (pad, pad)),
        dimension_numbers=("NCHW", "OIHW", "NCHW"),
    )
    scale = (gamma / jnp.sqrt(running_var + eps)).reshape(1, -1, 1, 1)
    bias = (beta - running_mean * gamma / jnp.sqrt(running_var + eps)).reshape(
        1, -1, 1, 1
    )
    return jnp.maximum(y * scale + bias, 0.0)


# ----------------------------------------------------------------------------
if __name__ == "__main__":
    key = jax.random.PRNGKey(0)
    k_x, k_w, k_g, k_b, k_m, k_v, k_w1 = jax.random.split(key, 7)

    N, Cin, H, W = 2, 4, 16, 16
    Cout = 8

    x = jax.random.normal(k_x, (N, Cin, H, W), dtype=jnp.float32)
    gamma = 1.0 + 0.1 * jax.random.normal(k_g, (Cout,), dtype=jnp.float32)
    beta = 0.1 * jax.random.normal(k_b, (Cout,), dtype=jnp.float32)
    running_mean = 0.1 * jax.random.normal(k_m, (Cout,), dtype=jnp.float32)
    running_var = jnp.abs(1.0 + 0.1 * jax.random.normal(k_v, (Cout,), dtype=jnp.float32))

    # Case 1: ConvBlock(4, 8, kernel_size=3, stride=1)  (im2col path)
    w3 = jax.random.normal(k_w, (Cout, Cin, 3, 3), dtype=jnp.float32) * 0.1
    out3 = jax.block_until_ready(
        conv_block_forward(x, w3, gamma, beta, running_mean, running_var, stride=1)
    )
    ref3 = conv_block_reference(x, w3, gamma, beta, running_mean, running_var, stride=1)
    assert out3.shape == (N, Cout, H, W), out3.shape
    # bf16 MXU operands (f32 accumulation) -> relaxed tolerance vs f32 reference.
    assert jnp.allclose(out3, ref3, atol=2e-2, rtol=2e-2), float(
        jnp.max(jnp.abs(out3 - ref3))
    )

    # Case 2: ConvBlock(4, 8, kernel_size=1, stride=2)  (1x1 fast path)
    w1 = jax.random.normal(k_w1, (Cout, Cin, 1, 1), dtype=jnp.float32) * 0.1
    out1 = jax.block_until_ready(
        conv_block_forward(x, w1, gamma, beta, running_mean, running_var, stride=2)
    )
    ref1 = conv_block_reference(x, w1, gamma, beta, running_mean, running_var, stride=2)
    assert out1.shape == (N, Cout, H // 2, W // 2), out1.shape
    assert jnp.allclose(out1, ref1, atol=2e-2, rtol=2e-2), float(
        jnp.max(jnp.abs(out1 - ref1))
    )

    print("KERNEL_OK")
</pallas_src>

<mosaic_0001>
module attributes {stable_mosaic.version = 11 : i64} {
  func.func @_convblock_kernel(%arg0: i32, %arg1: i32, %arg2: i32, %arg3: memref<512x36xbf16, #tpu.memory_space<vmem>>, %arg4: memref<36x128xbf16, #tpu.memory_space<vmem>>, %arg5: memref<1x128xf32, #tpu.memory_space<vmem>>, %arg6: memref<512x128xf32, #tpu.memory_space<vmem>>, %arg7: memref<512x128xf32, #tpu.memory_space<vmem>>) attributes {dimension_semantics = [#tpu.dimension_semantics<parallel>, #tpu.dimension_semantics<parallel>, #tpu.dimension_semantics<arbitrary>], iteration_bounds = array<i64: 1, 1, 1>, scalar_prefetch = 0 : i64, scratch_operands = 1 : i64, tpu.core_type = #tpu.core_type<tc>, window_params = [{transform_indices = @transform_0, window_bounds = array<i64: 512, 36>}, {transform_indices = @transform_1, window_bounds = array<i64: 36, 128>}, {transform_indices = @transform_2, window_bounds = array<i64: 1, 128>}, {transform_indices = @transform_3, window_bounds = array<i64: 512, 128>}]} {
    %c0_i32 = arith.constant 0 : i32
    %0 = arith.cmpi eq, %arg2, %c0_i32 : i32
    %1 = arith.extui %0 : i1 to i32
    %c0_i32_0 = arith.constant 0 : i32
    %2 = arith.cmpi ne, %1, %c0_i32_0 : i32
    scf.if %2 {
      %cst_10 = arith.constant 0.000000e+00 : f32
      %12 = vector.broadcast %cst_10 : f32 to vector<512x128xf32>
      %c0_11 = arith.constant 0 : index
      %c0_12 = arith.constant 0 : index
      %13 = vector.load %arg7[%c0_11, %c0_12] : memref<512x128xf32, #tpu.memory_space<vmem>>, vector<512x128xf32>
      tpu.vector_store %arg7[%c0_11, %c0_12], %12 {strides = array<i32>} : memref<512x128xf32, #tpu.memory_space<vmem>>, vector<512x128xf32>,
    } else {
    }
    %c0 = arith.constant 0 : index
    %c0_1 = arith.constant 0 : index
    %3 = vector.load %arg7[%c0, %c0_1] : memref<512x128xf32, #tpu.memory_space<vmem>>, vector<512x128xf32>
    %c0_2 = arith.constant 0 : index
    %c0_3 = arith.constant 0 : index
    %4 = vector.load %arg3[%c0_2, %c0_3] : memref<512x36xbf16, #tpu.memory_space<vmem>>, vector<512x36xbf16>
    %c0_4 = arith.constant 0 : index
    %c0_5 = arith.constant 0 : index
    %5 = vector.load %arg4[%c0_4, %c0_5] : memref<36x128xbf16, #tpu.memory_space<vmem>>, vector<36x128xbf16>
    %cst = arith.constant dense<0.000000e+00> : vector<512x128xf32>
    %6 = tpu.matmul %4, %5, %cst {dimension_numbers = #tpu.dot_dimension_numbers<[1], [0], [0], [1], [0, 0, 1, 1], [], []>} : vector<512x36xbf16>, vector<36x128xbf16>, vector<512x128xf32> -> vector<512x128xf32>
    %7 = arith.addf %3, %6 : vector<512x128xf32>
    %c0_6 = arith.constant 0 : index
    %c0_7 = arith.constant 0 : index
    %8 = vector.load %arg7[%c0_6, %c0_7] : memref<512x128xf32, #tpu.memory_space<vmem>>, vector<512x128xf32>
    tpu.vector_store %arg7[%c0_6, %c0_7], %7 {strides = array<i32>} : memref<512x128xf32, #tpu.memory_space<vmem>>, vector<512x128xf32>,
    %c0_i32_8 = arith.constant 0 : i32
    %9 = arith.cmpi eq, %arg2, %c0_i32_8 : i32
    %10 = arith.extui %9 : i1 to i32
    %c0_i32_9 = arith.constant 0 : i32
    %11 = arith.cmpi ne, %10, %c0_i32_9 : i32
    scf.if %11 {
      %c0_10 = arith.constant 0 : index
      %c0_11 = arith.constant 0 : index
      %12 = vector.load %arg7[%c0_10, %c0_11] : memref<512x128xf32, #tpu.memory_space<vmem>>, vector<512x128xf32>
      %c0_12 = arith.constant 0 : index
      %c0_13 = arith.constant 0 : index
      %13 = vector.load %arg5[%c0_12, %c0_13] : memref<1x128xf32, #tpu.memory_space<vmem>>, vector<1x128xf32>
      %14 = vector.broadcast %13 : vector<1x128xf32> to vector<512x128xf32>
      %15 = arith.addf %12, %14 : vector<512x128xf32>
      %cst_14 = arith.constant 0.000000e+00 : f32
      %16 = vector.broadcast %cst_14 : f32 to vector<512x128xf32>
      %17 = arith.maximumf %15, %16 : vector<512x128xf32>
      %c0_15 = arith.constant 0 : index
      %c0_16 = arith.constant 0 : index
      %18 = vector.load %arg6[%c0_15, %c0_16] : memref<512x128xf32, #tpu.memory_space<vmem>>, vector<512x128xf32>
      tpu.vector_store %arg6[%c0_15, %c0_16], %17 {strides = array<i32>} : memref<512x128xf32, #tpu.memory_space<vmem>>, vector<512x128xf32>,
    } else {
    }
    return
  }
  func.func @transform_0(%arg0: i32, %arg1: i32, %arg2: i32) -> (i32, i32) {
    %c0_i32 = arith.constant 0 : i32
    return %arg0, %arg2 : i32, i32
  }
  func.func @transform_1(%arg0: i32, %arg1: i32, %arg2: i32) -> (i32, i32) {
    %c0_i32 = arith.constant 0 : i32
    return %arg2, %arg1 : i32, i32
  }
  func.func @transform_2(%arg0: i32, %arg1: i32, %arg2: i32) -> (i32, i32) {
    %c0_i32 = arith.constant 0 : i32
    %c0_i32_0 = arith.constant 0 : i32
    return %c0_i32, %arg1 : i32, i32
  }
  func.func @transform_3(%arg0: i32, %arg1: i32, %arg2: i32) -> (i32, i32) {
    %c0_i32 = arith.constant 0 : i32
    return %arg0, %arg1 : i32, i32
  }
}

</mosaic_0001>

<bundles_post_ra>
// kernel: conv_block_forward.1
= control target key start
LH: loop header
LB: loop body
LE: loop exit
PB: predicated region body
PF: predicated region fallthrough
CT: control target
= control target key end

     0   :  { %vm488_vm0 = vcmask 1041408   ;;  %vm391_vm1 = vcmask 293888   ;;  %s1813_s1 = inlined_call_operand.vmem [shape: bf16[36,128], index: 1, kind: input, shape index: {}]   ;;  %s1814_s0 = inlined_call_operand.vmem [shape: bf16[512,36], index: 0, kind: input, shape index: {}]   ;;  %s1815_s2 = inlined_call_operand.vmem [shape: f32[1,128], index: 2, kind: input, shape index: {}]   ;;  %s1816_s3 = inlined_call_operand.vmem [shape: f32[512,128], index: 3, kind: output, shape index: {}]  }
   0x1   :  { %v1360_v0 = vld [vmem:[%s1813_s1 + $0x10] ss:$0 sps:$4 sm:$0x33]   ;;  %v1361_v1 = vld [vmem:[%s1813_s1 + $0x8] sm:$0xff]   ;;  %v1362_v3 = vld [vmem:[%s1813_s1] sm:$0xff]  }
   0x2   :  { %1358 = vmatprep.subr.msk.bf16.mxu0 %vm488_vm0, %v1360_v0  ;;  %1359 = vmatprep.subr.msk.bf16.mxu1 %vm488_vm0, %v1360_v0  ;;  %v490_v2 = vsel %vm488_vm0, %v1360_v0, 0  ;;  %v1363_v4 = vld [vmem:[%s1814_s0] sm:$0xff]   ;;  %v1365_v6 = vld [vmem:[%s1814_s0 + $0x8] sm:$0xff]   ;;  %v1367_v8 = vld [vmem:[%s1814_s0 + $0x10] sm:$0xff]  }
   0x3   :  { %1283 = vmatpush3.bf16.msra.mxu0 %v490_v2  ;;  %1355 = vmatpush3.bf16.msra.mxu1 %v490_v2  ;;  %v1364_v5 = vld [vmem:[%s1814_s0 + $0x80] sm:$0xff]   ;;  %v1366_v7 = vld [vmem:[%s1814_s0 + $0x88] sm:$0xff]   ;;  %v1368_v9 = vld [vmem:[%s1814_s0 + $0x90] sm:$0xff]  }
   0x4   :  { %1284 = vmatprep.subr.bf16.mxu0 %v1361_v1  ;;  %1353 = vmatprep.subr.bf16.mxu1 %v1361_v1  ;;  %v1369_v10 = vld [vmem:[%s1814_s0 + $0x18] sm:$0xff]   ;;  %v1371_v12 = vld [vmem:[%s1814_s0 + $0x20] sm:$0xff]   ;;  %v1373_v14 = vld [vmem:[%s1814_s0 + $0x28] sm:$0xff]  }
   0x5   :  { %1288 = vmatprep.mubr.msk.bf16.mxu0 %vm391_vm1, %v1363_v4  ;;  %1320 = vmatprep.mubr.msk.bf16.mxu1 %vm391_vm1, %v1364_v5  ;;  %v1370_v11 = vld [vmem:[%s1814_s0 + $0x98] sm:$0xff]   ;;  %v1372_v13 = vld [vmem:[%s1814_s0 + $0xa0] sm:$0xff]   ;;  %v1374_v15 = vld [vmem:[%s1814_s0 + $0xa8] sm:$0xff]  }
   0x6   :  { %v1375_v16 = vld [vmem:[%s1814_s0 + $0x30] sm:$0xff]   ;;  %v1377_v18 = vld [vmem:[%s1814_s0 + $0x38] sm:$0xff]   ;;  %v1379_v20 = vld [vmem:[%s1814_s0 + $0x40] sm:$0xff]  }
   0x7   :  { %1285 = vmatpush3.bf16.msra.mxu0 %v1361_v1  ;;  %1356 = vmatpush3.bf16.msra.mxu1 %v1361_v1  ;;  %v1376_v17 = vld [vmem:[%s1814_s0 + $0xb0] sm:$0xff]   ;;  %v1378_v19 = vld [vmem:[%s1814_s0 + $0xb8] sm:$0xff]   ;;  %v1380_v21 = vld [vmem:[%s1814_s0 + $0xc0] sm:$0xff]  }
   0x8   :  { %1286 = vmatprep.subr.bf16.mxu0 %v1362_v3  ;;  %1354 = vmatprep.subr.bf16.mxu1 %v1362_v3  ;;  %v1381_v22 = vld [vmem:[%s1814_s0 + $0x48] sm:$0xff]   ;;  %v1383_v24 = vld [vmem:[%s1814_s0 + $0x50] sm:$0xff]   ;;  %v1385_v26 = vld [vmem:[%s1814_s0 + $0x58] sm:$0xff]  }
   0x9   :  { %v1382_v23 = vld [vmem:[%s1814_s0 + $0xc8] sm:$0xff]   ;;  %v1384_v25 = vld [vmem:[%s1814_s0 + $0xd0] sm:$0xff]   ;;  %v1386_v27 = vld [vmem:[%s1814_s0 + $0xd8] sm:$0xff]  }
   0xa   :  { %v1387_v28 = vld [vmem:[%s1814_s0 + $0x60] sm:$0xff]   ;;  %v1389_v30 = vld [vmem:[%s1814_s0 + $0x68] sm:$0xff]   ;;  %v1391_v32 = vld [vmem:[%s1814_s0 + $0x70] sm:$0xff]  }
   0xb   :  { %1287 = vmatpush3.bf16.msra.mxu0 %v1362_v3  ;;  %1357 = vmatpush3.bf16.msra.mxu1 %v1362_v3  ;;  %v1388_v29 = vld [vmem:[%s1814_s0 + $0xe0] sm:$0xff]   ;;  %v1390_v31 = vld [vmem:[%s1814_s0 + $0xe8] sm:$0xff]   ;;  %v1392_v33 = vld [vmem:[%s1814_s0 + $0xf0] sm:$0xff]  }
   0xc   :  { %v1393_v34 = vld [vmem:[%s1814_s0 + $0x78] sm:$0xff]   ;;  %v1555_v36 = vld [vmem:[%s1815_s2] ss:$0 sm:$0xff] }
   0xd   :  { %v1394_v35 = vld [vmem:[%s1814_s0 + $0xf8] sm:$0xff]  }
   0xe   :  { %1289 = vmatmul.mubr.msk.bf16.vlgmr.msra.gmra.mxu0 %vm391_vm1, %v1365_v6  ;;  %1321 = vmatmul.mubr.msk.bf16.vlgmr.msra.gmra.mxu1 %vm391_vm1, %v1366_v7 }
   0xf   :  { %1292 = vmatprep.mubr.msk.bf16.mxu0 %vm391_vm1, %v1367_v8  ;;  %1324 = vmatprep.mubr.msk.bf16.mxu1 %vm391_vm1, %v1368_v9 }
  0x16   :  { %1293 = vmatmul.mubr.msk.bf16.gmra.mxu0 %vm391_vm1, %v1369_v10  ;;  %1325 = vmatmul.mubr.msk.bf16.gmra.mxu1 %vm391_vm1, %v1370_v11 }
  0x17   :  { %1296 = vmatprep.mubr.msk.bf16.mxu0 %vm391_vm1, %v1371_v12  ;;  %1328 = vmatprep.mubr.msk.bf16.mxu1 %vm391_vm1, %v1372_v13 }
  0x1e   :  { %1297 = vmatmul.mubr.msk.bf16.gmra.mxu0 %vm391_vm1, %v1373_v14  ;;  %1329 = vmatmul.mubr.msk.bf16.gmra.mxu1 %vm391_vm1, %v1374_v15 }
  0x1f   :  { %1300 = vmatprep.mubr.msk.bf16.mxu0 %vm391_vm1, %v1375_v16  ;;  %1332 = vmatprep.mubr.msk.bf16.mxu1 %vm391_vm1, %v1376_v17 }
  0x26   :  { %1301 = vmatmul.mubr.msk.bf16.gmra.mxu0 %vm391_vm1, %v1377_v18  ;;  %1333 = vmatmul.mubr.msk.bf16.gmra.mxu1 %vm391_vm1, %v1378_v19 }
  0x27   :  { %1304 = vmatprep.mubr.msk.bf16.mxu0 %vm391_vm1, %v1379_v20  ;;  %1336 = vmatprep.mubr.msk.bf16.mxu1 %vm391_vm1, %v1380_v21 }
  0x2e   :  { %1305 = vmatmul.mubr.msk.bf16.gmra.mxu0 %vm391_vm1, %v1381_v22  ;;  %1337 = vmatmul.mubr.msk.bf16.gmra.mxu1 %vm391_vm1, %v1382_v23 }
  0x2f   :  { %1308 = vmatprep.mubr.msk.bf16.mxu0 %vm391_vm1, %v1383_v24  ;;  %1340 = vmatprep.mubr.msk.bf16.mxu1 %vm391_vm1, %v1384_v25 }
  0x36   :  { %1309 = vmatmul.mubr.msk.bf16.gmra.mxu0 %vm391_vm1, %v1385_v26  ;;  %1341 = vmatmul.mubr.msk.bf16.gmra.mxu1 %vm391_vm1, %v1386_v27 }
  0x37   :  { %1312 = vmatprep.mubr.msk.bf16.mxu0 %vm391_vm1, %v1387_v28  ;;  %1344 = vmatprep.mubr.msk.bf16.mxu1 %vm391_vm1, %v1388_v29 }
  0x3e   :  { %1313 = vmatmul.mubr.msk.bf16.gmra.mxu0 %vm391_vm1, %v1389_v30  ;;  %1345 = vmatmul.mubr.msk.bf16.gmra.mxu1 %vm391_vm1, %v1390_v31 }
  0x3f   :  { %1316 = vmatprep.mubr.msk.bf16.mxu0 %vm391_vm1, %v1391_v32  ;;  %1348 = vmatprep.mubr.msk.bf16.mxu1 %vm391_vm1, %v1392_v33 }
  0x46   :  { %1317 = vmatmul.mubr.msk.bf16.gmra.mxu0 %vm391_vm1, %v1393_v34  ;;  %1349 = vmatmul.mubr.msk.bf16.gmra.mxu1 %vm391_vm1, %v1394_v35 }
  0xce   :  { %v1290_v37 = vpop.f32.mrf.mxu0  ;;  %v1322_v38 = vpop.f32.mrf.mxu1 }
  0xcf   :  { %v985_v39 = vadd.f32 %v1290_v37, %v1555_v36  ;;  %v1017_v40 = vadd.f32 %v1322_v38, %v1555_v36 }
  0xd0   :  { %v526_v41 = vpop.f32.mrf.mxu0  ;;  %v654_v42 = vpop.f32.mrf.mxu1 }
  0xd1   :  { %v1049_v43 = vmax.f32 %v985_v39, 0.0  ;;  %v1081_v44 = vmax.f32 %v1017_v40, 0.0  ;;  %v983_v45 = vadd.f32 %v1555_v36, %v526_v41  ;;  %v1015_v46 = vadd.f32 %v1555_v36, %v654_v42 }
  0xd2   :  { %v1291_v47 = vpop.f32.mrf.mxu0  ;;  %v1323_v48 = vpop.f32.mrf.mxu1 }
  0xd3   :  { %1113 = vst [vmem:[%s1816_s3 + $0x10] sm:$0xff] %v1049_v43  ;;  %1145 = vst [vmem:[%s1816_s3 + $0x110] sm:$0xff] %v1081_v44  ;;  %v1047_v49 = vmax.f32 %v983_v45, 0.0  ;;  %v1079_v50 = vmax.f32 %v1015_v46, 0.0  ;;  %v986_v51 = vadd.f32 %v1291_v47, %v1555_v36  ;;  %v1018_v52 = vadd.f32 %v1323_v48, %v1555_v36 }
  0xd4   :  { %v529_v53 = vpop.f32.mrf.mxu0  ;;  %v657_v54 = vpop.f32.mrf.mxu1 }
  0xd5   :  { %1111 = vst [vmem:[%s1816_s3] sm:$0xff] %v1047_v49  ;;  %1143 = vst [vmem:[%s1816_s3 + $0x100] sm:$0xff] %v1079_v50  ;;  %v1050_v55 = vmax.f32 %v986_v51, 0.0  ;;  %v1082_v56 = vmax.f32 %v1018_v52, 0.0  ;;  %v984_v57 = vadd.f32 %v1555_v36, %v529_v53  ;;  %v1016_v58 = vadd.f32 %v1555_v36, %v657_v54 }
  0xd6   :  { %v1294_v59 = vpop.f32.mrf.mxu0  ;;  %v1326_v60 = vpop.f32.mrf.mxu1 }
  0xd7   :  { %1114 = vst [vmem:[%s1816_s3 + $0x18] sm:$0xff] %v1050_v55  ;;  %1146 = vst [vmem:[%s1816_s3 + $0x118] sm:$0xff] %v1082_v56  ;;  %v1048_v61 = vmax.f32 %v984_v57, 0.0  ;;  %v1080_v62 = vmax.f32 %v1016_v58, 0.0  ;;  %v989_v63 = vadd.f32 %v1294_v59, %v1555_v36  ;;  %v1021_v0 = vadd.f32 %v1326_v60, %v1555_v36 }
  0xd8   :  { %v542_v1 = vpop.f32.mrf.mxu0  ;;  %v670_v2 = vpop.f32.mrf.mxu1 }
  0xd9   :  { %1112 = vst [vmem:[%s1816_s3 + $0x8] sm:$0xff] %v1048_v61  ;;  %1144 = vst [vmem:[%s1816_s3 + $0x108] sm:$0xff] %v1080_v62  ;;  %v1053_v3 = vmax.f32 %v989_v63, 0.0  ;;  %v1085_v4 = vmax.f32 %v1021_v0, 0.0  ;;  %v987_v5 = vadd.f32 %v1555_v36, %v542_v1  ;;  %v1019_v6 = vadd.f32 %v1555_v36, %v670_v2 }
  0xda   :  { %v1295_v7 = vpop.f32.mrf.mxu0  ;;  %v1327_v8 = vpop.f32.mrf.mxu1 }
  0xdb   :  { %1117 = vst [vmem:[%s1816_s3 + $0x30] sm:$0xff] %v1053_v3  ;;  %1149 = vst [vmem:[%s1816_s3 + $0x130] sm:$0xff] %v1085_v4  ;;  %v1051_v9 = vmax.f32 %v987_v5, 0.0  ;;  %v1083_v10 = vmax.f32 %v1019_v6, 0.0  ;;  %v990_v11 = vadd.f32 %v1295_v7, %v1555_v36  ;;  %v1022_v12 = vadd.f32 %v1327_v8, %v1555_v36 }
  0xdc   :  { %v545_v13 = vpop.f32.mrf.mxu0  ;;  %v673_v14 = vpop.f32.mrf.mxu1 }
  0xdd   :  { %1115 = vst [vmem:[%s1816_s3 + $0x20] sm:$0xff] %v1051_v9  ;;  %1147 = vst [vmem:[%s1816_s3 + $0x120] sm:$0xff] %v1083_v10  ;;  %v1054_v15 = vmax.f32 %v990_v11, 0.0  ;;  %v1086_v16 = vmax.f32 %v1022_v12, 0.0  ;;  %v988_v17 = vadd.f32 %v1555_v36, %v545_v13  ;;  %v1020_v18 = vadd.f32 %v1555_v36, %v673_v14 }
  0xde   :  { %v1298_v19 = vpop.f32.mrf.mxu0  ;;  %v1330_v20 = vpop.f32.mrf.mxu1 }
  0xdf   :  { %1118 = vst [vmem:[%s1816_s3 + $0x38] sm:$0xff] %v1054_v15  ;;  %1150 = vst [vmem:[%s1816_s3 + $0x138] sm:$0xff] %v1086_v16  ;;  %v1052_v21 = vmax.f32 %v988_v17, 0.0  ;;  %v1084_v22 = vmax.f32 %v1020_v18, 0.0  ;;  %v993_v23 = vadd.f32 %v1298_v19, %v1555_v36  ;;  %v1025_v24 = vadd.f32 %v1330_v20, %v1555_v36 }
  0xe0   :  { %v558_v25 = vpop.f32.mrf.mxu0  ;;  %v686_v26 = vpop.f32.mrf.mxu1 }
  0xe1   :  { %1116 = vst [vmem:[%s1816_s3 + $0x28] sm:$0xff] %v1052_v21  ;;  %1148 = vst [vmem:[%s1816_s3 + $0x128] sm:$0xff] %v1084_v22  ;;  %v1057_v27 = vmax.f32 %v993_v23, 0.0  ;;  %v1089_v28 = vmax.f32 %v1025_v24, 0.0  ;;  %v991_v29 = vadd.f32 %v1555_v36, %v558_v25  ;;  %v1023_v30 = vadd.f32 %v1555_v36, %v686_v26 }
  0xe2   :  { %v1299_v31 = vpop.f32.mrf.mxu0  ;;  %v1331_v32 = vpop.f32.mrf.mxu1 }
  0xe3   :  { %1121 = vst [vmem:[%s1816_s3 + $0x50] sm:$0xff] %v1057_v27  ;;  %1153 = vst [vmem:[%s1816_s3 + $0x150] sm:$0xff] %v1089_v28  ;;  %v1055_v33 = vmax.f32 %v991_v29, 0.0  ;;  %v1087_v34 = vmax.f32 %v1023_v30, 0.0  ;;  %v994_v35 = vadd.f32 %v1299_v31, %v1555_v36  ;;  %v1026_v37 = vadd.f32 %v1331_v32, %v1555_v36 }
  0xe4   :  { %v561_v38 = vpop.f32.mrf.mxu0  ;;  %v689_v39 = vpop.f32.mrf.mxu1 }
  0xe5   :  { %1119 = vst [vmem:[%s1816_s3 + $0x40] sm:$0xff] %v1055_v33  ;;  %1151 = vst [vmem:[%s1816_s3 + $0x140] sm:$0xff] %v1087_v34  ;;  %v1058_v40 = vmax.f32 %v994_v35, 0.0  ;;  %v1090_v41 = vmax.f32 %v1026_v37, 0.0  ;;  %v992_v42 = vadd.f32 %v1555_v36, %v561_v38  ;;  %v1024_v43 = vadd.f32 %v1555_v36, %v689_v39 }
  0xe6   :  { %v1302_v44 = vpop.f32.mrf.mxu0  ;;  %v1334_v45 = vpop.f32.mrf.mxu1 }
  0xe7   :  { %1122 = vst [vmem:[%s1816_s3 + $0x58] sm:$0xff] %v1058_v40  ;;  %1154 = vst [vmem:[%s1816_s3 + $0x158] sm:$0xff] %v1090_v41  ;;  %v1056_v46 = vmax.f32 %v992_v42, 0.0  ;;  %v1088_v47 = vmax.f32 %v1024_v43, 0.0  ;;  %v997_v48 = vadd.f32 %v1302_v44, %v1555_v36  ;;  %v1029_v49 = vadd.f32 %v1334_v45, %v1555_v36 }
  0xe8   :  { %v574_v50 = vpop.f32.mrf.mxu0  ;;  %v702_v51 = vpop.f32.mrf.mxu1 }
  0xe9   :  { %1120 = vst [vmem:[%s1816_s3 + $0x48] sm:$0xff] %v1056_v46  ;;  %1152 = vst [vmem:[%s1816_s3 + $0x148] sm:$0xff] %v1088_v47  ;;  %v1061_v52 = vmax.f32 %v997_v48, 0.0  ;;  %v1093_v53 = vmax.f32 %v1029_v49, 0.0  ;;  %v995_v54 = vadd.f32 %v1555_v36, %v574_v50  ;;  %v1027_v55 = vadd.f32 %v1555_v36, %v702_v51 }
  0xea   :  { %v1303_v56 = vpop.f32.mrf.mxu0  ;;  %v1335_v57 = vpop.f32.mrf.mxu1 }
  0xeb   :  { %1125 = vst [vmem:[%s1816_s3 + $0x70] sm:$0xff] %v1061_v52  ;;  %1157 = vst [vmem:[%s1816_s3 + $0x170] sm:$0xff] %v1093_v53  ;;  %v1059_v58 = vmax.f32 %v995_v54, 0.0  ;;  %v1091_v59 = vmax.f32 %v1027_v55, 0.0  ;;  %v998_v60 = vadd.f32 %v1303_v56, %v1555_v36  ;;  %v1030_v61 = vadd.f32 %v1335_v57, %v1555_v36 }
  0xec   :  { %v577_v62 = vpop.f32.mrf.mxu0  ;;  %v705_v63 = vpop.f32.mrf.mxu1 }
  0xed   :  { %1123 = vst [vmem:[%s1816_s3 + $0x60] sm:$0xff] %v1059_v58  ;;  %1155 = vst [vmem:[%s1816_s3 + $0x160] sm:$0xff] %v1091_v59  ;;  %v1062_v0 = vmax.f32 %v998_v60, 0.0  ;;  %v1094_v1 = vmax.f32 %v1030_v61, 0.0  ;;  %v996_v2 = vadd.f32 %v1555_v36, %v577_v62  ;;  %v1028_v3 = vadd.f32 %v1555_v36, %v705_v63 }
  0xee   :  { %v1306_v4 = vpop.f32.mrf.mxu0  ;;  %v1338_v5 = vpop.f32.mrf.mxu1 }
  0xef   :  { %1126 = vst [vmem:[%s1816_s3 + $0x78] sm:$0xff] %v1062_v0  ;;  %1158 = vst [vmem:[%s1816_s3 + $0x178] sm:$0xff] %v1094_v1  ;;  %v1060_v6 = vmax.f32 %v996_v2, 0.0  ;;  %v1092_v7 = vmax.f32 %v1028_v3, 0.0  ;;  %v1001_v8 = vadd.f32 %v1306_v4, %v1555_v36  ;;  %v1033_v9 = vadd.f32 %v1338_v5, %v1555_v36 }
  0xf0   :  { %v590_v10 = vpop.f32.mrf.mxu0  ;;  %v718_v11 = vpop.f32.mrf.mxu1 }
  0xf1   :  { %1124 = vst [vmem:[%s1816_s3 + $0x68] sm:$0xff] %v1060_v6  ;;  %1156 = vst [vmem:[%s1816_s3 + $0x168] sm:$0xff] %v1092_v7  ;;  %v1065_v12 = vmax.f32 %v1001_v8, 0.0  ;;  %v1097_v13 = vmax.f32 %v1033_v9, 0.0  ;;  %v999_v14 = vadd.f32 %v1555_v36, %v590_v10  ;;  %v1031_v15 = vadd.f32 %v1555_v36, %v718_v11 }
  0xf2   :  { %v1307_v16 = vpop.f32.mrf.mxu0  ;;  %v1339_v17 = vpop.f32.mrf.mxu1 }
  0xf3   :  { %1129 = vst [vmem:[%s1816_s3 + $0x90] sm:$0xff] %v1065_v12  ;;  %1161 = vst [vmem:[%s1816_s3 + $0x190] sm:$0xff] %v1097_v13  ;;  %v1063_v18 = vmax.f32 %v999_v14, 0.0  ;;  %v1095_v19 = vmax.f32 %v1031_v15, 0.0  ;;  %v1002_v20 = vadd.f32 %v1307_v16, %v1555_v36  ;;  %v1034_v21 = vadd.f32 %v1339_v17, %v1555_v36 }
  0xf4   :  { %v593_v22 = vpop.f32.mrf.mxu0  ;;  %v721_v23 = vpop.f32.mrf.mxu1 }
  0xf5   :  { %1127 = vst [vmem:[%s1816_s3 + $0x80] sm:$0xff] %v1063_v18  ;;  %1159 = vst [vmem:[%s1816_s3 + $0x180] sm:$0xff] %v1095_v19  ;;  %v1066_v24 = vmax.f32 %v1002_v20, 0.0  ;;  %v1098_v25 = vmax.f32 %v1034_v21, 0.0  ;;  %v1000_v26 = vadd.f32 %v1555_v36, %v593_v22  ;;  %v1032_v27 = vadd.f32 %v1555_v36, %v721_v23 }
  0xf6   :  { %v1310_v28 = vpop.f32.mrf.mxu0  ;;  %v1342_v29 = vpop.f32.mrf.mxu1 }
  0xf7   :  { %1130 = vst [vmem:[%s1816_s3 + $0x98] sm:$0xff] %v1066_v24  ;;  %1162 = vst [vmem:[%s1816_s3 + $0x198] sm:$0xff] %v1098_v25  ;;  %v1064_v30 = vmax.f32 %v1000_v26, 0.0  ;;  %v1096_v31 = vmax.f32 %v1032_v27, 0.0  ;;  %v1005_v32 = vadd.f32 %v1310_v28, %v1555_v36  ;;  %v1037_v33 = vadd.f32 %v1342_v29, %v1555_v36 }
  0xf8   :  { %v606_v34 = vpop.f32.mrf.mxu0  ;;  %v734_v35 = vpop.f32.mrf.mxu1 }
  0xf9   :  { %1128 = vst [vmem:[%s1816_s3 + $0x88] sm:$0xff] %v1064_v30  ;;  %1160 = vst [vmem:[%s1816_s3 + $0x188] sm:$0xff] %v1096_v31  ;;  %v1069_v37 = vmax.f32 %v1005_v32, 0.0  ;;  %v1101_v38 = vmax.f32 %v1037_v33, 0.0  ;;  %v1003_v39 = vadd.f32 %v1555_v36, %v606_v34  ;;  %v1035_v40 = vadd.f32 %v1555_v36, %v734_v35 }
  0xfa   :  { %v1311_v41 = vpop.f32.mrf.mxu0  ;;  %v1343_v42 = vpop.f32.mrf.mxu1 }
  0xfb   :  { %1133 = vst [vmem:[%s1816_s3 + $0xb0] sm:$0xff] %v1069_v37  ;;  %1165 = vst [vmem:[%s1816_s3 + $0x1b0] sm:$0xff] %v1101_v38  ;;  %v1067_v43 = vmax.f32 %v1003_v39, 0.0  ;;  %v1099_v44 = vmax.f32 %v1035_v40, 0.0  ;;  %v1006_v45 = vadd.f32 %v1311_v41, %v1555_v36  ;;  %v1038_v46 = vadd.f32 %v1343_v42, %v1555_v36 }
  0xfc   :  { %v609_v47 = vpop.f32.mrf.mxu0  ;;  %v737_v48 = vpop.f32.mrf.mxu1 }
  0xfd   :  { %1131 = vst [vmem:[%s1816_s3 + $0xa0] sm:$0xff] %v1067_v43  ;;  %1163 = vst [vmem:[%s1816_s3 + $0x1a0] sm:$0xff] %v1099_v44  ;;  %v1070_v49 = vmax.f32 %v1006_v45, 0.0  ;;  %v1102_v50 = vmax.f32 %v1038_v46, 0.0  ;;  %v1004_v51 = vadd.f32 %v1555_v36, %v609_v47  ;;  %v1036_v52 = vadd.f32 %v1555_v36, %v737_v48 }
  0xfe   :  { %v1314_v53 = vpop.f32.mrf.mxu0  ;;  %v1346_v54 = vpop.f32.mrf.mxu1 }
  0xff   :  { %1134 = vst [vmem:[%s1816_s3 + $0xb8] sm:$0xff] %v1070_v49  ;;  %1166 = vst [vmem:[%s1816_s3 + $0x1b8] sm:$0xff] %v1102_v50  ;;  %v1068_v55 = vmax.f32 %v1004_v51, 0.0  ;;  %v1100_v56 = vmax.f32 %v1036_v52, 0.0  ;;  %v1009_v57 = vadd.f32 %v1314_v53, %v1555_v36  ;;  %v1041_v58 = vadd.f32 %v1346_v54, %v1555_v36 }
 0x100   :  { %v622_v59 = vpop.f32.mrf.mxu0  ;;  %v750_v60 = vpop.f32.mrf.mxu1 }
 0x101   :  { %1132 = vst [vmem:[%s1816_s3 + $0xa8] sm:$0xff] %v1068_v55  ;;  %1164 = vst [vmem:[%s1816_s3 + $0x1a8] sm:$0xff] %v1100_v56  ;;  %v1073_v61 = vmax.f32 %v1009_v57, 0.0  ;;  %v1105_v62 = vmax.f32 %v1041_v58, 0.0  ;;  %v1007_v63 = vadd.f32 %v1555_v36, %v622_v59  ;;  %v1039_v0 = vadd.f32 %v1555_v36, %v750_v60 }
 0x102   :  { %v1315_v1 = vpop.f32.mrf.mxu0  ;;  %v1347_v2 = vpop.f32.mrf.mxu1 }
 0x103   :  { %1137 = vst [vmem:[%s1816_s3 + $0xd0] sm:$0xff] %v1073_v61  ;;  %1169 = vst [vmem:[%s1816_s3 + $0x1d0] sm:$0xff] %v1105_v62  ;;  %v1071_v3 = vmax.f32 %v1007_v63, 0.0  ;;  %v1103_v4 = vmax.f32 %v1039_v0, 0.0  ;;  %v1010_v5 = vadd.f32 %v1315_v1, %v1555_v36  ;;  %v1042_v6 = vadd.f32 %v1347_v2, %v1555_v36 }
 0x104   :  { %v625_v7 = vpop.f32.mrf.mxu0  ;;  %v753_v8 = vpop.f32.mrf.mxu1 }
 0x105   :  { %1135 = vst [vmem:[%s1816_s3 + $0xc0] sm:$0xff] %v1071_v3  ;;  %1167 = vst [vmem:[%s1816_s3 + $0x1c0] sm:$0xff] %v1103_v4  ;;  %v1074_v9 = vmax.f32 %v1010_v5, 0.0  ;;  %v1106_v10 = vmax.f32 %v1042_v6, 0.0  ;;  %v1008_v11 = vadd.f32 %v1555_v36, %v625_v7  ;;  %v1040_v12 = vadd.f32 %v1555_v36, %v753_v8 }
 0x106   :  { %v1318_v13 = vpop.f32.mrf.mxu0  ;;  %v1350_v14 = vpop.f32.mrf.mxu1 }
 0x107   :  { %1138 = vst [vmem:[%s1816_s3 + $0xd8] sm:$0xff] %v1074_v9  ;;  %1170 = vst [vmem:[%s1816_s3 + $0x1d8] sm:$0xff] %v1106_v10  ;;  %v1072_v15 = vmax.f32 %v1008_v11, 0.0  ;;  %v1104_v16 = vmax.f32 %v1040_v12, 0.0  ;;  %v1013_v17 = vadd.f32 %v1318_v13, %v1555_v36  ;;  %v1045_v18 = vadd.f32 %v1350_v14, %v1555_v36 }
 0x108   :  { %v638_v19 = vpop.f32.mrf.mxu0  ;;  %v766_v20 = vpop.f32.mrf.mxu1 }
 0x109   :  { %1136 = vst [vmem:[%s1816_s3 + $0xc8] sm:$0xff] %v1072_v15  ;;  %1168 = vst [vmem:[%s1816_s3 + $0x1c8] sm:$0xff] %v1104_v16  ;;  %v1077_v21 = vmax.f32 %v1013_v17, 0.0  ;;  %v1109_v22 = vmax.f32 %v1045_v18, 0.0  ;;  %v1011_v23 = vadd.f32 %v1555_v36, %v638_v19  ;;  %v1043_v24 = vadd.f32 %v1555_v36, %v766_v20 }
 0x10a   :  { %v1319_v25 = vpop.f32.mrf.mxu0  ;;  %v1351_v26 = vpop.f32.mrf.mxu1 }
 0x10b   :  { %1141 = vst [vmem:[%s1816_s3 + $0xf0] sm:$0xff] %v1077_v21  ;;  %1173 = vst [vmem:[%s1816_s3 + $0x1f0] sm:$0xff] %v1109_v22  ;;  %v1075_v27 = vmax.f32 %v1011_v23, 0.0  ;;  %v1107_v28 = vmax.f32 %v1043_v24, 0.0  ;;  %v1014_v29 = vadd.f32 %v1319_v25, %v1555_v36  ;;  %v1046_v30 = vadd.f32 %v1351_v26, %v1555_v36 }
 0x10c   :  { %v641_v31 = vpop.f32.mrf.mxu0  ;;  %v769_v32 = vpop.f32.mrf.mxu1 }
 0x10d   :  { %1139 = vst [vmem:[%s1816_s3 + $0xe0] sm:$0xff] %v1075_v27  ;;  %1171 = vst [vmem:[%s1816_s3 + $0x1e0] sm:$0xff] %v1107_v28  ;;  %v1078_v33 = vmax.f32 %v1014_v29, 0.0  ;;  %v1110_v34 = vmax.f32 %v1046_v30, 0.0  ;;  %v1012_v35 = vadd.f32 %v1555_v36, %v641_v31  ;;  %v1044_v37 = vadd.f32 %v1555_v36, %v769_v32 }
 0x10f   :  { %1142 = vst [vmem:[%s1816_s3 + $0xf8] sm:$0xff] %v1078_v33  ;;  %1174 = vst [vmem:[%s1816_s3 + $0x1f8] sm:$0xff] %v1110_v34  ;;  %v1076_v38 = vmax.f32 %v1012_v35, 0.0  ;;  %v1108_v39 = vmax.f32 %v1044_v37, 0.0 }
 0x111   :  { %1140 = vst [vmem:[%s1816_s3 + $0xe8] sm:$0xff] %v1076_v38  ;;  %1172 = vst [vmem:[%s1816_s3 + $0x1e8] sm:$0xff] %v1108_v39 }

</bundles_post_ra>
